<compile_context>
chip_gen: v6e
topology: v6e:2x2x1
jax: 0.10.0
libtpu: 0.0.40
codegen_flags: <defaults>
</compile_context>

<pallas_src>
import functools

import jax
import jax.numpy as jnp
from jax.experimental import pallas as pl
from jax.experimental.pallas import tpu as pltpu

_NEG_INF = -1e30  # finite stand-in for masked_fill(-inf); exp() underflows to exactly 0


def _round_up(x, m):
    return (x + m - 1) // m * m


def _divisors(n, cap, sublane_aligned=False):
    """Divisors of n usable as a block dim (optionally multiple-of-8 or the full dim)."""
    ds = [d for d in range(1, n + 1)
          if n % d == 0 and d <= cap and (not sublane_aligned or d % 8 == 0 or d == n)]
    return ds or [n]


def _choose_tiles(B, T, S_p, D_p, itemsize, n_weights, budget_bytes=20 << 20):
    """Pick (B_blk, T_blk) so one grid step's VMEM footprint fits `budget_bytes`.

    Conservative for v7x (64 MiB VMEM / 32 MiB default scoped); the same tiling also
    works on v5e/v6e (128 MiB).
    """
    def footprint(bb, tt):
        io = 2 * itemsize * (bb * tt * D_p        # source block (double-buffered)
                             + bb * S_p * D_p     # memory block
                             + bb * tt * D_p      # attn_h block
                             + bb * tt * S_p)     # align block
        w = 2 * itemsize * n_weights * D_p * D_p  # resident projection weights
        tmp = 4 * 3 * (tt * S_p + tt * D_p)       # rough f32 per-row intermediates
        return io + w + tmp

    bbs = _divisors(B, 8)                          # batch dim is a major dim: any divisor
    tts = _divisors(T, 128, sublane_aligned=True)  # query dim hits the (8,128) rule
    for bb in sorted(bbs, reverse=True):
        for tt in sorted(tts, reverse=True):
            if footprint(bb, tt) <= budget_bytes:
                return bb, tt
    # TODO(synk): for very long sources / huge dim, tile S with an online (flash-style)
    # softmax instead of falling back to the smallest batch/query tiles.
    return min(bbs), min(tts)


def _make_attention_kernel(general, B_blk):
    """Fused score + mask + softmax + context + output-projection kernel.

    One grid step processes B_blk batch rows and a T_blk query tile.  The (unrolled)
    per-batch loop keeps every matmul a plain 2-D MXU op and every ref access a
    leading-dim index (cheap, layout-friendly).
    """

    def kernel(lens_ref, *refs):
        if general:
            src_ref, mem_ref, win_ref, wc_ref, ws_ref, attn_ref, align_ref = refs
        else:
            src_ref, mem_ref, wc_ref, ws_ref, attn_ref, align_ref = refs
            win_ref = None

        b_blk = pl.program_id(0)
        T_blk = src_ref.shape[1]
        S_p = mem_ref.shape[1]

        # Projection weights are VMEM-resident across the whole grid (constant index_map).
        wc = wc_ref[...]
        ws = ws_ref[...]
        win = win_ref[...] if general else None
        col = jax.lax.broadcasted_iota(jnp.int32, (T_blk, S_p), 1)

        for k in range(B_blk):                       # unrolled; B_blk <= 8
            s_k = src_ref[k]                         # (T_blk, D)  native dtype
            m_k = mem_ref[k]                         # (S_p, D)    native dtype

            q_k = s_k
            if general:
                # 'general': q = source @ W_in^T, accumulated in f32 on the MXU.
                q_k = jnp.dot(s_k, win,
                              preferred_element_type=jnp.float32).astype(s_k.dtype)

            # scores[t, j] = q[t, :] . m[j, :]  (contract on D; f32 accumulation)
            scores = jax.lax.dot_general(q_k, m_k, (((1,), (1,)), ((), ())),
                                         preferred_element_type=jnp.float32)

            # sequence_mask + masked_fill(-inf); also masks the S lane padding.
            # NOTE: length == 0 yields a uniform row (PyTorch's -inf path gives NaNs).
            length = lens_ref[b_blk * B_blk + k]
            scores = jnp.where(col < length, scores, _NEG_INF)

            # Numerically stable softmax; reciprocal runs on the (otherwise idle) EUP.
            mx = jnp.max(scores, axis=-1, keepdims=True)
            e = jnp.exp(scores - mx)
            denom = jnp.sum(e, axis=-1, keepdims=True)
            p = e * pl.reciprocal(denom, approx=False)   # exact (align may feed losses)

            # Context + fused output projection; linear_out is pre-split -> no concat.
            c = jnp.dot(p.astype(m_k.dtype), m_k, preferred_element_type=jnp.float32)
            attn = jnp.tanh(
                jnp.dot(c.astype(wc.dtype), wc, preferred_element_type=jnp.float32)
                + jnp.dot(s_k, ws, preferred_element_type=jnp.float32))

            attn_ref[k] = attn.astype(attn_ref.dtype)
            align_ref[k] = p.astype(align_ref.dtype)

    return kernel


@functools.partial(jax.jit, static_argnames=("general", "transpose_out"))
def _global_attention_fwd(lengths, source, memory_bank, weights, *, general,
                          transpose_out):
    """source: (B,T,D), memory_bank: (B,S,D), lengths: (B,) int32, weights: (D_p,D_p)."""
    B, T, D = source.shape
    _, S, _ = memory_bank.shape
    D_p = weights[0].shape[0]          # weights are pre-padded to a lane multiple
    S_p = _round_up(S, 128)

    # Lane-dense padding (zeros): keeps MXU lanes full and align/attn stores unmasked.
    if D_p != D:
        source = jnp.pad(source, ((0, 0), (0, 0), (0, D_p - D)))
        memory_bank = jnp.pad(memory_bank, ((0, 0), (0, 0), (0, D_p - D)))
    if S_p != S:
        memory_bank = jnp.pad(memory_bank, ((0, 0), (0, S_p - S), (0, 0)))

    itemsize = source.dtype.itemsize
    B_blk, T_blk = _choose_tiles(B, T, S_p, D_p, itemsize, len(weights))
    grid = (B // B_blk, T // T_blk)

    w_specs = [pl.BlockSpec((D_p, D_p), lambda b, t, lens: (0, 0)) for _ in weights]
    grid_spec = pltpu.PrefetchScalarGridSpec(
        num_scalar_prefetch=1,                      # memory_lengths -> SMEM
        grid=grid,                                  # (batch tiles, query tiles)
        in_specs=[pl.BlockSpec((B_blk, T_blk, D_p), lambda b, t, lens: (b, t, 0)),
                  # memory index_map constant in t -> stays VMEM-resident across T tiles
                  pl.BlockSpec((B_blk, S_p, D_p), lambda b, t, lens: (b, 0, 0))]
                 + w_specs,
        out_specs=[pl.BlockSpec((B_blk, T_blk, D_p), lambda b, t, lens: (b, t, 0)),
                   pl.BlockSpec((B_blk, T_blk, S_p), lambda b, t, lens: (b, t, 0))],
    )

    n_proj = len(weights)
    cost = pl.CostEstimate(
        flops=int(4 * B * T * S_p * D_p + 2 * B * T * D_p * D_p * n_proj),
        transcendentals=int(B * T * (S_p + D_p + 1)),
        bytes_accessed=int(itemsize * (source.size + memory_bank.size
                                       + sum(w.size for w in weights)
                                       + B * T * D_p + B * T * S_p)),
    )

    attn_h, align = pl.pallas_call(
        _make_attention_kernel(general, B_blk),
        out_shape=(jax.ShapeDtypeStruct((B, T, D_p), source.dtype),
                   jax.ShapeDtypeStruct((B, T, S_p), source.dtype)),   # align: input dtype
        grid_spec=grid_spec,
        compiler_params=pltpu.CompilerParams(
            dimension_semantics=("parallel", "parallel"),   # both axes split on v7x's 2 TCs
            vmem_limit_bytes=32 * 1024 * 1024),             # > v5e's 16 MiB default
        cost_estimate=cost,
    )(lengths, source, memory_bank, *weights)

    attn_h = attn_h[..., :D]
    align = align[..., :S]
    if transpose_out:
        # TODO(synk): write (tgt, batch, .) directly from the kernel (needs an in-kernel
        # sublane relayout); for now it is one fused XLA transpose+slice pass.
        attn_h = jnp.transpose(attn_h, (1, 0, 2))
        align = jnp.transpose(align, (1, 0, 2))
    return attn_h, align


class GlobalAttention:
    """JAX/Pallas port of GlobalAttention (forward only, attn_type in {'dot','general'})."""
    # TODO(synk): 'mlp' (Bahdanau) attention and the coverage term are not implemented.

    def __init__(self, dim, coverage=False, attn_type="dot", attn_func="softmax", *,
                 key, param_dtype=jnp.float32):
        assert attn_type in ("dot", "general"), "only 'dot'/'general' are implemented"
        assert attn_func == "softmax"
        assert not coverage, "coverage not implemented"
        self.dim = dim
        self.dim_padded = _round_up(dim, 128)      # lane-aligned feature dim
        self.attn_type = attn_type

        k_out, k_in = jax.random.split(key)
        bound_out = (6.0 / (dim + 2 * dim)) ** 0.5          # xavier_uniform-like
        w_out = jax.random.uniform(k_out, (dim, 2 * dim), jnp.float32, -bound_out, bound_out)

        def _prep(w):
            # linear(x) = x @ W^T -> store W^T, zero-padded to the lane-aligned dim.
            # Use param_dtype=jnp.bfloat16 in production (halves resident VMEM on v5e).
            wt = jnp.zeros((self.dim_padded, self.dim_padded), jnp.float32)
            wt = wt.at[:dim, :dim].set(w.T)
            return wt.astype(param_dtype)

        # linear_out(x) = x @ W_out^T with x = [c, source]; split -> no in-kernel concat.
        self.wc_t = _prep(w_out[:, :dim])          # applied to the context c
        self.ws_t = _prep(w_out[:, dim:])          # applied to the query/source
        if attn_type == "general":
            bound_in = (6.0 / (dim + dim)) ** 0.5
            w_in = jax.random.uniform(k_in, (dim, dim), jnp.float32, -bound_in, bound_in)
            self.win_t = _prep(w_in)

    def __call__(self, source, memory_bank, memory_lengths=None, coverage=None):
        assert coverage is None  # coverage not supported
        one_step = source.ndim == 2
        if one_step:
            source = source[:, None, :]
        B, S, _ = memory_bank.shape
        if memory_lengths is None:
            lengths = jnp.full((B,), S, jnp.int32)
        else:
            lengths = memory_lengths.astype(jnp.int32)

        general = self.attn_type == "general"
        weights = (self.win_t, self.wc_t, self.ws_t) if general else (self.wc_t, self.ws_t)
        attn_h, align = _global_attention_fwd(lengths, source, memory_bank, weights,
                                              general=general, transpose_out=not one_step)
        if one_step:
            return attn_h[:, 0, :], align[:, 0, :]
        return attn_h, align


def _ref_forward(source, memory_bank, lengths, wc_t, ws_t, win_t=None):
    """Pure-JAX reference mirroring the PyTorch forward (for verification)."""
    one_step = source.ndim == 2
    if one_step:
        source = source[:, None, :]
    q = source if win_t is None else source @ win_t
    align = jnp.einsum("btd,bsd->bts", q, memory_bank)
    S = memory_bank.shape[1]
    mask = jnp.arange(S)[None, None, :] < lengths[:, None, None]
    align = jnp.where(mask, align, -jnp.inf)
    p = jax.nn.softmax(align, axis=-1)
    c = jnp.einsum("bts,bsd->btd", p, memory_bank)
    attn = jnp.tanh(c @ wc_t + source @ ws_t)
    if one_step:
        return attn[:, 0, :], p[:, 0, :]
    return jnp.transpose(attn, (1, 0, 2)), jnp.transpose(p, (1, 0, 2))


if __name__ == "__main__":
    batch, tgt_len, src_len, dim = 2, 8, 16, 32
    key = jax.random.PRNGKey(0)
    key, ks, km, kp1, kp2 = jax.random.split(key, 5)

    source = jax.random.normal(ks, (batch, tgt_len, dim), jnp.float32)
    memory_bank = jax.random.normal(km, (batch, src_len, dim), jnp.float32)
    memory_lengths = jnp.array([11, 16], jnp.int32)   # partial and full length rows

    # --- dot attention, multi-step queries (f32) ---
    attn_dot = GlobalAttention(dim, attn_type="dot", key=kp1)
    attn_h, align = attn_dot(source, memory_bank, memory_lengths)
    attn_h = jax.block_until_ready(attn_h)
    align = jax.block_until_ready(align)
    ref_h, ref_a = _ref_forward(source, memory_bank, memory_lengths,
                                attn_dot.wc_t[:dim, :dim], attn_dot.ws_t[:dim, :dim])
    assert attn_h.shape == (tgt_len, batch, dim)
    assert align.shape == (tgt_len, batch, src_len)
    assert jnp.allclose(attn_h, ref_h, atol=2e-5, rtol=2e-5)
    assert jnp.allclose(align, ref_a, atol=2e-5, rtol=2e-5)

    # --- general attention, one-step (2-D) query (f32) ---
    attn_gen = GlobalAttention(dim, attn_type="general", key=kp2)
    q1 = source[:, 0, :]
    attn_h1, align1 = attn_gen(q1, memory_bank, memory_lengths)
    attn_h1 = jax.block_until_ready(attn_h1)
    align1 = jax.block_until_ready(align1)
    ref_h1, ref_a1 = _ref_forward(q1, memory_bank, memory_lengths,
                                  attn_gen.wc_t[:dim, :dim], attn_gen.ws_t[:dim, :dim],
                                  attn_gen.win_t[:dim, :dim])
    assert attn_h1.shape == (batch, dim)
    assert align1.shape == (batch, src_len)
    assert jnp.allclose(attn_h1, ref_h1, atol=2e-5, rtol=2e-5)
    assert jnp.allclose(align1, ref_a1, atol=2e-5, rtol=2e-5)

    # --- bf16 smoke test (native MXU dtype path): shape/dtype/sanity checks only ---
    attn_bf = GlobalAttention(dim, attn_type="dot", key=kp1, param_dtype=jnp.bfloat16)
    h_bf, a_bf = attn_bf(source.astype(jnp.bfloat16),
                         memory_bank.astype(jnp.bfloat16), memory_lengths)
    h_bf = jax.block_until_ready(h_bf)
    a_bf = jax.block_until_ready(a_bf)
    assert h_bf.dtype == jnp.bfloat16 and a_bf.dtype == jnp.bfloat16
    assert h_bf.shape == (tgt_len, batch, dim) and a_bf.shape == (tgt_len, batch, src_len)
    assert bool(jnp.all(jnp.isfinite(h_bf.astype(jnp.float32))))
    row_sums = jnp.sum(a_bf.astype(jnp.float32), axis=-1)
    assert bool(jnp.all(jnp.abs(row_sums - 1.0) < 2e-2))

    print("KERNEL_OK")
</pallas_src>

<mosaic_0001>
module attributes {stable_mosaic.version = 11 : i64} {
  func.func @kernel(%arg0: i32, %arg1: i32, %arg2: memref<2xi32, #tpu.memory_space<smem>>, %arg3: memref<2x8x128xf32, #tpu.memory_space<vmem>>, %arg4: memref<2x128x128xf32, #tpu.memory_space<vmem>>, %arg5: memref<128x128xf32, #tpu.memory_space<vmem>>, %arg6: memref<128x128xf32, #tpu.memory_space<vmem>>, %arg7: memref<2x8x128xf32, #tpu.memory_space<vmem>>, %arg8: memref<2x8x128xf32, #tpu.memory_space<vmem>>) attributes {dimension_semantics = [#tpu.dimension_semantics<parallel>, #tpu.dimension_semantics<parallel>], iteration_bounds = array<i64: 1, 1>, scalar_prefetch = 1 : i64, scratch_operands = 0 : i64, tpu.core_type = #tpu.core_type<tc>, window_params = [{transform_indices = @transform_0, window_bounds = array<i64: 2, 8, 128>}, {transform_indices = @transform_1, window_bounds = array<i64: 2, 128, 128>}, {pipeline_mode = #tpu.pipeline_mode<synchronous>, transform_indices = @transform_2, window_bounds = array<i64: 128, 128>}, {pipeline_mode = #tpu.pipeline_mode<synchronous>, transform_indices = @transform_3, window_bounds = array<i64: 128, 128>}, {transform_indices = @transform_4, window_bounds = array<i64: 2, 8, 128>}, {transform_indices = @transform_5, window_bounds = array<i64: 2, 8, 128>}]} {
    %c0 = arith.constant 0 : index
    %c0_0 = arith.constant 0 : index
    %0 = vector.load %arg5[%c0, %c0_0] : memref<128x128xf32, #tpu.memory_space<vmem>>, vector<128x128xf32>
    %c0_1 = arith.constant 0 : index
    %c0_2 = arith.constant 0 : index
    %1 = vector.load %arg6[%c0_1, %c0_2] : memref<128x128xf32, #tpu.memory_space<vmem>>, vector<128x128xf32>
    %2 = tpu.iota {dimensions = array<i32: 1>} : vector<8x128xi32>
    %c0_3 = arith.constant 0 : index
    %c0_4 = arith.constant 0 : index
    %c0_5 = arith.constant 0 : index
    %3 = vector.load %arg3[%c0_3, %c0_4, %c0_5] : memref<2x8x128xf32, #tpu.memory_space<vmem>>, vector<1x8x128xf32>
    %4 = vector.shape_cast %3 : vector<1x8x128xf32> to vector<8x128xf32>
    %c0_6 = arith.constant 0 : index
    %c0_7 = arith.constant 0 : index
    %c0_8 = arith.constant 0 : index
    %5 = vector.load %arg4[%c0_6, %c0_7, %c0_8] : memref<2x128x128xf32, #tpu.memory_space<vmem>>, vector<1x128x128xf32>
    %6 = vector.shape_cast %5 : vector<1x128x128xf32> to vector<128x128xf32>
    %cst = arith.constant dense<0.000000e+00> : vector<8x128xf32>
    %7 = tpu.matmul %4, %6, %cst {dimension_numbers = #tpu.dot_dimension_numbers<[1], [1], [0], [0], [0, 0, 1, 0], [], []>} : vector<8x128xf32>, vector<128x128xf32>, vector<8x128xf32> -> vector<8x128xf32>
    %c2_i32 = arith.constant 2 : i32
    %8 = arith.muli %arg0, %c2_i32 : i32
    %c0_i32 = arith.constant 0 : i32
    %9 = arith.addi %8, %c0_i32 : i32
    %10 = arith.index_cast %9 : i32 to index
    %11 = memref.load %arg2[%10] : memref<2xi32, #tpu.memory_space<smem>>
    %12 = vector.broadcast %11 : i32 to vector<8x128xi32>
    %13 = arith.cmpi slt, %2, %12 : vector<8x128xi32>
    %cst_9 = arith.constant -1.000000e+30 : f32
    %14 = vector.broadcast %cst_9 : f32 to vector<8x128xf32>
    %15 = arith.select %13, %7, %14 : vector<8x128xi1>, vector<8x128xf32>
    %cst_10 = arith.constant dense<0xFF800000> : vector<8xf32>
    %16 = vector.multi_reduction <maximumf>, %15, %cst_10 [1] : vector<8x128xf32> to vector<8xf32>
    %17 = vector.shape_cast %16 : vector<8xf32> to vector<8x1xf32>
    %18 = vector.broadcast %17 : vector<8x1xf32> to vector<8x128xf32>
    %19 = arith.subf %15, %18 : vector<8x128xf32>
    %20 = math.exp %19 : vector<8x128xf32>
    %cst_11 = arith.constant dense<0.000000e+00> : vector<8xf32>
    %21 = vector.multi_reduction <add>, %20, %cst_11 [1] : vector<8x128xf32> to vector<8xf32>
    %22 = vector.shape_cast %21 : vector<8xf32> to vector<8x1xf32>
    %23 = tpu.reciprocal %22 : vector<8x1xf32> -> vector<8x1xf32>
    %24 = vector.broadcast %23 : vector<8x1xf32> to vector<8x128xf32>
    %25 = arith.mulf %20, %24 : vector<8x128xf32>
    %cst_12 = arith.constant dense<0.000000e+00> : vector<8x128xf32>
    %26 = tpu.matmul %25, %6, %cst_12 {dimension_numbers = #tpu.dot_dimension_numbers<[1], [0], [0], [1], [0, 0, 1, 1], [], []>} : vector<8x128xf32>, vector<128x128xf32>, vector<8x128xf32> -> vector<8x128xf32>
    %cst_13 = arith.constant dense<0.000000e+00> : vector<8x128xf32>
    %27 = tpu.matmul %26, %0, %cst_13 {dimension_numbers = #tpu.dot_dimension_numbers<[1], [0], [0], [1], [0, 0, 1, 1], [], []>} : vector<8x128xf32>, vector<128x128xf32>, vector<8x128xf32> -> vector<8x128xf32>
    %cst_14 = arith.constant dense<0.000000e+00> : vector<8x128xf32>
    %28 = tpu.matmul %4, %1, %cst_14 {dimension_numbers = #tpu.dot_dimension_numbers<[1], [0], [0], [1], [0, 0, 1, 1], [], []>} : vector<8x128xf32>, vector<128x128xf32>, vector<8x128xf32> -> vector<8x128xf32>
    %29 = arith.addf %27, %28 : vector<8x128xf32>
    %30 = math.tanh %29 : vector<8x128xf32>
    %c0_15 = arith.constant 0 : index
    %c0_16 = arith.constant 0 : index
    %c0_17 = arith.constant 0 : index
    %31 = vector.load %arg7[%c0_15, %c0_16, %c0_17] : memref<2x8x128xf32, #tpu.memory_space<vmem>>, vector<1x8x128xf32>
    %32 = vector.shape_cast %31 : vector<1x8x128xf32> to vector<8x128xf32>
    %33 = vector.shape_cast %30 : vector<8x128xf32> to vector<1x8x128xf32>
    tpu.vector_store %arg7[%c0_15, %c0_16, %c0_17], %33 {strides = array<i32>} : memref<2x8x128xf32, #tpu.memory_space<vmem>>, vector<1x8x128xf32>,
    %c0_18 = arith.constant 0 : index
    %c0_19 = arith.constant 0 : index
    %c0_20 = arith.constant 0 : index
    %34 = vector.load %arg8[%c0_18, %c0_19, %c0_20] : memref<2x8x128xf32, #tpu.memory_space<vmem>>, vector<1x8x128xf32>
    %35 = vector.shape_cast %34 : vector<1x8x128xf32> to vector<8x128xf32>
    %36 = vector.shape_cast %25 : vector<8x128xf32> to vector<1x8x128xf32>
    tpu.vector_store %arg8[%c0_18, %c0_19, %c0_20], %36 {strides = array<i32>} : memref<2x8x128xf32, #tpu.memory_space<vmem>>, vector<1x8x128xf32>,
    %c1 = arith.constant 1 : index
    %c0_21 = arith.constant 0 : index
    %c0_22 = arith.constant 0 : index
    %37 = vector.load %arg3[%c1, %c0_21, %c0_22] : memref<2x8x128xf32, #tpu.memory_space<vmem>>, vector<1x8x128xf32>
    %38 = vector.shape_cast %37 : vector<1x8x128xf32> to vector<8x128xf32>
    %c1_23 = arith.constant 1 : index
    %c0_24 = arith.constant 0 : index
    %c0_25 = arith.constant 0 : index
    %39 = vector.load %arg4[%c1_23, %c0_24, %c0_25] : memref<2x128x128xf32, #tpu.memory_space<vmem>>, vector<1x128x128xf32>
    %40 = vector.shape_cast %39 : vector<1x128x128xf32> to vector<128x128xf32>
    %cst_26 = arith.constant dense<0.000000e+00> : vector<8x128xf32>
    %41 = tpu.matmul %38, %40, %cst_26 {dimension_numbers = #tpu.dot_dimension_numbers<[1], [1], [0], [0], [0, 0, 1, 0], [], []>} : vector<8x128xf32>, vector<128x128xf32>, vector<8x128xf32> -> vector<8x128xf32>
    %c2_i32_27 = arith.constant 2 : i32
    %42 = arith.muli %arg0, %c2_i32_27 : i32
    %c1_i32 = arith.constant 1 : i32
    %43 = arith.addi %42, %c1_i32 : i32
    %44 = arith.index_cast %43 : i32 to index
    %45 = memref.load %arg2[%44] : memref<2xi32, #tpu.memory_space<smem>>
    %46 = vector.broadcast %45 : i32 to vector<8x128xi32>
    %47 = arith.cmpi slt, %2, %46 : vector<8x128xi32>
    %cst_28 = arith.constant -1.000000e+30 : f32
    %48 = vector.broadcast %cst_28 : f32 to vector<8x128xf32>
    %49 = arith.select %47, %41, %48 : vector<8x128xi1>, vector<8x128xf32>
    %cst_29 = arith.constant dense<0xFF800000> : vector<8xf32>
    %50 = vector.multi_reduction <maximumf>, %49, %cst_29 [1] : vector<8x128xf32> to vector<8xf32>
    %51 = vector.shape_cast %50 : vector<8xf32> to vector<8x1xf32>
    %52 = vector.broadcast %51 : vector<8x1xf32> to vector<8x128xf32>
    %53 = arith.subf %49, %52 : vector<8x128xf32>
    %54 = math.exp %53 : vector<8x128xf32>
    %cst_30 = arith.constant dense<0.000000e+00> : vector<8xf32>
    %55 = vector.multi_reduction <add>, %54, %cst_30 [1] : vector<8x128xf32> to vector<8xf32>
    %56 = vector.shape_cast %55 : vector<8xf32> to vector<8x1xf32>
    %57 = tpu.reciprocal %56 : vector<8x1xf32> -> vector<8x1xf32>
    %58 = vector.broadcast %57 : vector<8x1xf32> to vector<8x128xf32>
    %59 = arith.mulf %54, %58 : vector<8x128xf32>
    %cst_31 = arith.constant dense<0.000000e+00> : vector<8x128xf32>
    %60 = tpu.matmul %59, %40, %cst_31 {dimension_numbers = #tpu.dot_dimension_numbers<[1], [0], [0], [1], [0, 0, 1, 1], [], []>} : vector<8x128xf32>, vector<128x128xf32>, vector<8x128xf32> -> vector<8x128xf32>
    %cst_32 = arith.constant dense<0.000000e+00> : vector<8x128xf32>
    %61 = tpu.matmul %60, %0, %cst_32 {dimension_numbers = #tpu.dot_dimension_numbers<[1], [0], [0], [1], [0, 0, 1, 1], [], []>} : vector<8x128xf32>, vector<128x128xf32>, vector<8x128xf32> -> vector<8x128xf32>
    %cst_33 = arith.constant dense<0.000000e+00> : vector<8x128xf32>
    %62 = tpu.matmul %38, %1, %cst_33 {dimension_numbers = #tpu.dot_dimension_numbers<[1], [0], [0], [1], [0, 0, 1, 1], [], []>} : vector<8x128xf32>, vector<128x128xf32>, vector<8x128xf32> -> vector<8x128xf32>
    %63 = arith.addf %61, %62 : vector<8x128xf32>
    %64 = math.tanh %63 : vector<8x128xf32>
    %c1_34 = arith.constant 1 : index
    %c0_35 = arith.constant 0 : index
    %c0_36 = arith.constant 0 : index
    %65 = vector.load %arg7[%c1_34, %c0_35, %c0_36] : memref<2x8x128xf32, #tpu.memory_space<vmem>>, vector<1x8x128xf32>
    %66 = vector.shape_cast %65 : vector<1x8x128xf32> to vector<8x128xf32>
    %67 = vector.shape_cast %64 : vector<8x128xf32> to vector<1x8x128xf32>
    tpu.vector_store %arg7[%c1_34, %c0_35, %c0_36], %67 {strides = array<i32>} : memref<2x8x128xf32, #tpu.memory_space<vmem>>, vector<1x8x128xf32>,
    %c1_37 = arith.constant 1 : index
    %c0_38 = arith.constant 0 : index
    %c0_39 = arith.constant 0 : index
    %68 = vector.load %arg8[%c1_37, %c0_38, %c0_39] : memref<2x8x128xf32, #tpu.memory_space<vmem>>, vector<1x8x128xf32>
    %69 = vector.shape_cast %68 : vector<1x8x128xf32> to vector<8x128xf32>
    %70 = vector.shape_cast %59 : vector<8x128xf32> to vector<1x8x128xf32>
    tpu.vector_store %arg8[%c1_37, %c0_38, %c0_39], %70 {strides = array<i32>} : memref<2x8x128xf32, #tpu.memory_space<vmem>>, vector<1x8x128xf32>,
    return
  }
  func.func @transform_0(%arg0: i32, %arg1: i32, %arg2: memref<2xi32, #tpu.memory_space<smem>>) -> (i32, i32, i32) {
    %c0_i32 = arith.constant 0 : i32
    %c0_i32_0 = arith.constant 0 : i32
    return %arg0, %arg1, %c0_i32 : i32, i32, i32
  }
  func.func @transform_1(%arg0: i32, %arg1: i32, %arg2: memref<2xi32, #tpu.memory_space<smem>>) -> (i32, i32, i32) {
    %c0_i32 = arith.constant 0 : i32
    %c0_i32_0 = arith.constant 0 : i32
    %c0_i32_1 = arith.constant 0 : i32
    return %arg0, %c0_i32, %c0_i32_0 : i32, i32, i32
  }
  func.func @transform_2(%arg0: i32, %arg1: i32, %arg2: memref<2xi32, #tpu.memory_space<smem>>) -> (i32, i32) {
    %c0_i32 = arith.constant 0 : i32
    %c0_i32_0 = arith.constant 0 : i32
    %c0_i32_1 = arith.constant 0 : i32
    return %c0_i32, %c0_i32_0 : i32, i32
  }
  func.func @transform_3(%arg0: i32, %arg1: i32, %arg2: memref<2xi32, #tpu.memory_space<smem>>) -> (i32, i32) {
    %c0_i32 = arith.constant 0 : i32
    %c0_i32_0 = arith.constant 0 : i32
    %c0_i32_1 = arith.constant 0 : i32
    return %c0_i32, %c0_i32_0 : i32, i32
  }
  func.func @transform_4(%arg0: i32, %arg1: i32, %arg2: memref<2xi32, #tpu.memory_space<smem>>) -> (i32, i32, i32) {
    %c0_i32 = arith.constant 0 : i32
    %c0_i32_0 = arith.constant 0 : i32
    return %arg0, %arg1, %c0_i32 : i32, i32, i32
  }
  func.func @transform_5(%arg0: i32, %arg1: i32, %arg2: memref<2xi32, #tpu.memory_space<smem>>) -> (i32, i32, i32) {
    %c0_i32 = arith.constant 0 : i32
    %c0_i32_0 = arith.constant 0 : i32
    return %arg0, %arg1, %c0_i32 : i32, i32, i32
  }
}

</mosaic_0001>

<bundles_post_ra>
// kernel: _global_attention_fwd.1
= control target key start
LH: loop header
LB: loop body
LE: loop exit
PB: predicated region body
PF: predicated region fallthrough
CT: control target
= control target key end

     0   :  { %s1760_s0 = inlined_call_operand.vmem [shape: s32[2], index: 0, kind: input, shape index: {}]   ;;  %s1761_s1 = inlined_call_operand.vmem [shape: f32[2,8,128], index: 1, kind: input, shape index: {}]   ;;  %s1762_s2 = inlined_call_operand.vmem [shape: f32[2,128,128], index: 2, kind: input, shape index: {}]   ;;  %s1763_s3 = inlined_call_operand.vmem [shape: f32[128,128], index: 3, kind: input, shape index: {}]   ;;  %s1764_s4 = inlined_call_operand.vmem [shape: f32[128,128], index: 4, kind: input, shape index: {}]   ;;  %s1765_s5 = inlined_call_operand.vmem [shape: f32[2,8,128], index: 5, kind: output, shape index: {0}]   ;;  %s1766_s6 = inlined_call_operand.vmem [shape: f32[2,8,128], index: 6, kind: output, shape index: {1}]  }
   0x1   :  { %s12_s23 = sshll.u32 %s1760_s0, 4  ;;  %s13_s23 = int_to_ptr.vmem [resolvable:$true] %s12_s23 }
   0x2   :  { %s1151_s24 = scalar_lea.vmem %s13_s23, 16  ;;  %p1156_p1 = scmp.lt.s32.totalorder %s13_s23, %s13_s23 }
   0x3   :  { %p1152_p0 = scmp.ne.s32.totalorder %s13_s23, %s1151_s24  ;;  %p1157_p2 = scmp.lt.s32.totalorder %s1151_s24, %s1151_s24 }
   0x5   :  { %p1158_p3 = por %p1157_p2, %p1156_p1 }
   0x7   :  { %p1159_p4 = pnand %p1158_p3, %p1152_p0 }
   0x9   :  { %1162 = shalt.err (!%p1159_p4)  }
   0xa   :  { %s1165_s25 = smov [#allocation3]  }
   0xb   :  { %15 = dma.vmem_to_smem %s13_s23, 16, %s1165_s25, [#allocation2] }
   0xc   :  { %1163 = dma.done.wait [#allocation2], 16 }
   0xd   :  { %1164 = vsyncadd [#allocation2], 4294967280 }
   0xe   :  { %17 = sfence }
   0xf   :  { %v76_v0 = vld [vmem:[%s1762_s2 + $0x78] sm:$0xff]  ;;  %v1166_v1 = vmov 0.0   ;;  %vm1167_vm0 = vmmov 0   ;;  %v75_v2 = vld [vmem:[%s1762_s2 + $0x70] sm:$0xff]  ;;  %v74_v3 = vld [vmem:[%s1762_s2 + $0x68] sm:$0xff]  ;;  %s148_s10 = sld [smem:[#allocation3]]  ;;  %v58_v18 = vlaneseq }
  0x10   :  { %856 = vmatprep.subr.mxu0 %v1166_v1  ;;  %888 = vmatprep.mubr.msk.f32.mxu0 %vm1167_vm0, %v1166_v1  ;;  %v73_v4 = vld [vmem:[%s1762_s2 + $0x60] sm:$0xff]  ;;  %v72_v5 = vld [vmem:[%s1762_s2 + $0x58] sm:$0xff]  ;;  %v71_v6 = vld [vmem:[%s1762_s2 + $0x50] sm:$0xff] }
  0x11   :  { %857 = vmatpush3.xpose.msra.mxu0 %v76_v0  ;;  %891 = vmatprep.subr.mxu1 %v1166_v1  ;;  %v70_v7 = vld [vmem:[%s1762_s2 + $0x48] sm:$0xff]  ;;  %v69_v8 = vld [vmem:[%s1762_s2 + $0x40] sm:$0xff]  ;;  %v68_v9 = vld [vmem:[%s1762_s2 + $0x38] sm:$0xff]  ;;  %v1300_v19 = vand.u32 127, %v58_v18 }
  0x12   :  { %858 = vmatprep.subr.mxu0 %v1166_v1  ;;  %892 = vmatpush3.msra.mxu1 %v76_v0  ;;  %v67_v10 = vld [vmem:[%s1762_s2 + $0x30] sm:$0xff]  ;;  %v66_v11 = vld [vmem:[%s1762_s2 + $0x28] sm:$0xff]  ;;  %v65_v12 = vld [vmem:[%s1762_s2 + $0x20] sm:$0xff] }
  0x13   :  { %893 = vmatprep.subr.mxu1 %v1166_v1  ;;  %923 = vmatprep.mubr.msk.f32.mxu1 %vm1167_vm0, %v1166_v1  ;;  %v64_v13 = vld [vmem:[%s1762_s2 + $0x18] sm:$0xff]  ;;  %v63_v14 = vld [vmem:[%s1762_s2 + $0x10] sm:$0xff]  ;;  %v62_v15 = vld [vmem:[%s1762_s2 + $0x8] sm:$0xff] }
  0x14   :  { %894 = vmatpush3.msra.mxu1 %v75_v2  ;;  %v61_v16 = vld [vmem:[%s1762_s2] sm:$0xff]  ;;  %v1306_v28 = vld [vmem:[%s1763_s3 + $0x78] sm:$0xff]  ;;  %v1311_v29 = vld [vmem:[%s1763_s3 + $0x70] sm:$0xff] }
  0x15   :  { %859 = vmatpush3.xpose.msra.mxu0 %v75_v2  ;;  %895 = vmatprep.subr.mxu1 %v1166_v1  ;;  %v1294_v17 = vld [vmem:[%s1761_s1] sm:$0xff]  ;;  %v149_v20 = vstv %s148_s10  ;;  %v1318_v30 = vld [vmem:[%s1763_s3 + $0x68] sm:$0xff]  ;;  %v1332_v32 = vld [vmem:[%s1763_s3 + $0x58] sm:$0xff] }
  0x16   :  { %860 = vmatprep.subr.mxu0 %v1166_v1  ;;  %896 = vmatpush3.msra.mxu1 %v74_v3  ;;  %vm150_vm1 = vcmp.lt.s32.totalorder %v1300_v19, %v149_v20  ;;  %v1325_v31 = vld [vmem:[%s1763_s3 + $0x60] sm:$0xff]  ;;  %v1339_v33 = vld [vmem:[%s1763_s3 + $0x50] sm:$0xff]  ;;  %v1346_v34 = vld [vmem:[%s1763_s3 + $0x48] sm:$0xff] }
  0x17   :  { %897 = vmatprep.subr.mxu1 %v1166_v1  ;;  %v1353_v35 = vld [vmem:[%s1763_s3 + $0x40] sm:$0xff]  ;;  %v1360_v36 = vld [vmem:[%s1763_s3 + $0x38] sm:$0xff]  ;;  %v1367_v38 = vld [vmem:[%s1763_s3 + $0x30] sm:$0xff] }
  0x18   :  { %898 = vmatpush3.msra.mxu1 %v73_v4  ;;  %v1374_v39 = vld [vmem:[%s1763_s3 + $0x28] sm:$0xff]  ;;  %v1381_v40 = vld [vmem:[%s1763_s3 + $0x20] sm:$0xff]  ;;  %v1388_v41 = vld [vmem:[%s1763_s3 + $0x18] sm:$0xff] }
  0x19   :  { %861 = vmatpush3.xpose.msra.mxu0 %v74_v3  ;;  %899 = vmatprep.subr.mxu1 %v1166_v1  ;;  %v1395_v42 = vld [vmem:[%s1763_s3 + $0x10] sm:$0xff]  ;;  %v1402_v43 = vld [vmem:[%s1763_s3 + $0x8] sm:$0xff]  ;;  %v1410_v46 = vld [vmem:[%s1764_s4 + $0x78] sm:$0xff] }
  0x1a   :  { %862 = vmatprep.subr.mxu0 %v1166_v1  ;;  %900 = vmatpush3.msra.mxu1 %v72_v5  ;;  %v1419_v47 = vld [vmem:[%s1764_s4 + $0x70] sm:$0xff]  ;;  %v1428_v48 = vld [vmem:[%s1764_s4 + $0x68] sm:$0xff]  ;;  %v1435_v49 = vld [vmem:[%s1764_s4 + $0x60] sm:$0xff] }
  0x1b   :  { %901 = vmatprep.subr.mxu1 %v1166_v1  ;;  %v1442_v50 = vld [vmem:[%s1764_s4 + $0x58] sm:$0xff]  ;;  %v1449_v51 = vld [vmem:[%s1764_s4 + $0x50] sm:$0xff]  ;;  %v1456_v52 = vld [vmem:[%s1764_s4 + $0x48] sm:$0xff] }
  0x1c   :  { %902 = vmatpush3.msra.mxu1 %v71_v6  ;;  %v1463_v53 = vld [vmem:[%s1764_s4 + $0x40] sm:$0xff]  ;;  %v1470_v54 = vld [vmem:[%s1764_s4 + $0x38] sm:$0xff]  ;;  %v1477_v55 = vld [vmem:[%s1764_s4 + $0x30] sm:$0xff] }
  0x1d   :  { %863 = vmatpush3.xpose.msra.mxu0 %v73_v4  ;;  %903 = vmatprep.subr.mxu1 %v1166_v1  ;;  %v1484_v56 = vld [vmem:[%s1764_s4 + $0x28] sm:$0xff]  ;;  %v1491_v57 = vld [vmem:[%s1764_s4 + $0x20] sm:$0xff]  ;;  %v1498_v58 = vld [vmem:[%s1764_s4 + $0x18] sm:$0xff] }
  0x1e   :  { %864 = vmatprep.subr.mxu0 %v1166_v1  ;;  %904 = vmatpush3.msra.mxu1 %v70_v7  ;;  %v1505_v59 = vld [vmem:[%s1764_s4 + $0x10] sm:$0xff]  ;;  %v1512_v60 = vld [vmem:[%s1764_s4 + $0x8] sm:$0xff]  ;;  %v1519_v61 = vld [vmem:[%s1764_s4] sm:$0xff] }
  0x1f   :  { %905 = vmatprep.subr.mxu1 %v1166_v1  ;;  %v1526_v62 = vld [vmem:[%s1762_s2 + $0xf8] sm:$0xff]  ;;  %v1538_v63 = vld [vmem:[%s1762_s2 + $0xf0] sm:$0xff]  ;;  %v1545_v0 = vld [vmem:[%s1762_s2 + $0xe8] sm:$0xff] }
  0x20   :  { %906 = vmatpush3.msra.mxu1 %v69_v8  ;;  %v1552_v2 = vld [vmem:[%s1762_s2 + $0xe0] sm:$0xff]  ;;  %v1559_v3 = vld [vmem:[%s1762_s2 + $0xd8] sm:$0xff]  ;;  %v1566_v4 = vld [vmem:[%s1762_s2 + $0xd0] sm:$0xff] }
  0x21   :  { %865 = vmatpush3.xpose.msra.mxu0 %v72_v5  ;;  %907 = vmatprep.subr.mxu1 %v1166_v1  ;;  %v1573_v5 = vld [vmem:[%s1762_s2 + $0xc8] sm:$0xff] }
  0x22   :  { %866 = vmatprep.subr.mxu0 %v1166_v1  ;;  %908 = vmatpush3.msra.mxu1 %v68_v9 }
  0x23   :  { %909 = vmatprep.subr.mxu1 %v1166_v1 }
  0x24   :  { %910 = vmatpush3.msra.mxu1 %v67_v10 }
  0x25   :  { %867 = vmatpush3.xpose.msra.mxu0 %v71_v6  ;;  %911 = vmatprep.subr.mxu1 %v1166_v1  ;;  %v1580_v6 = vld [vmem:[%s1762_s2 + $0xc0] sm:$0xff] }
  0x26   :  { %868 = vmatprep.subr.mxu0 %v1166_v1  ;;  %912 = vmatpush3.msra.mxu1 %v66_v11 }
  0x27   :  { %913 = vmatprep.subr.mxu1 %v1166_v1 }
  0x28   :  { %914 = vmatpush3.msra.mxu1 %v65_v12 }
  0x29   :  { %869 = vmatpush3.xpose.msra.mxu0 %v70_v7  ;;  %915 = vmatprep.subr.mxu1 %v1166_v1  ;;  %v1587_v7 = vld [vmem:[%s1762_s2 + $0xb8] sm:$0xff] }
  0x2a   :  { %870 = vmatprep.subr.mxu0 %v1166_v1  ;;  %916 = vmatpush3.msra.mxu1 %v64_v13 }
  0x2b   :  { %917 = vmatprep.subr.mxu1 %v1166_v1 }
  0x2c   :  { %918 = vmatpush3.msra.mxu1 %v63_v14 }
  0x2d   :  { %871 = vmatpush3.xpose.msra.mxu0 %v69_v8  ;;  %919 = vmatprep.subr.mxu1 %v1166_v1  ;;  %v26_v8 = vld [vmem:[%s1763_s3] sm:$0xff] }
  0x2e   :  { %872 = vmatprep.subr.mxu0 %v1166_v1  ;;  %920 = vmatpush3.msra.mxu1 %v62_v15 }
  0x2f   :  { %921 = vmatprep.subr.mxu1 %v1166_v1 }
  0x30   :  { %922 = vmatpush3.msra.mxu1 %v61_v16 }
  0x31   :  { %873 = vmatpush3.xpose.msra.mxu0 %v68_v9  ;;  %926 = vmatprep.subr.mxu1 %v1166_v1  ;;  %v1597_v9 = vld [vmem:[%s1762_s2 + $0xb0] sm:$0xff] }
  0x32   :  { %874 = vmatprep.subr.mxu0 %v1166_v1 }
  0x35   :  { %875 = vmatpush3.xpose.msra.mxu0 %v67_v10  ;;  %v1605_v10 = vld [vmem:[%s1762_s2 + $0xa8] sm:$0xff] }
  0x36   :  { %876 = vmatprep.subr.mxu0 %v1166_v1 }
  0x39   :  { %877 = vmatpush3.xpose.msra.mxu0 %v66_v11  ;;  %v1612_v11 = vld [vmem:[%s1762_s2 + $0xa0] sm:$0xff] }
  0x3a   :  { %878 = vmatprep.subr.mxu0 %v1166_v1 }
  0x3d   :  { %879 = vmatpush3.xpose.msra.mxu0 %v65_v12  ;;  %v1619_v12 = vld [vmem:[%s1762_s2 + $0x98] sm:$0xff] }
  0x3e   :  { %880 = vmatprep.subr.mxu0 %v1166_v1 }
  0x41   :  { %881 = vmatpush3.xpose.msra.mxu0 %v64_v13  ;;  %v1626_v13 = vld [vmem:[%s1762_s2 + $0x90] sm:$0xff] }
  0x42   :  { %882 = vmatprep.subr.mxu0 %v1166_v1 }
  0x45   :  { %883 = vmatpush3.xpose.msra.mxu0 %v63_v14  ;;  %v1633_v14 = vld [vmem:[%s1762_s2 + $0x88] sm:$0xff] }
  0x46   :  { %884 = vmatprep.subr.mxu0 %v1166_v1 }
  0x49   :  { %885 = vmatpush3.xpose.msra.mxu0 %v62_v15  ;;  %v1640_v15 = vld [vmem:[%s1762_s2 + $0x80] sm:$0xff] }
  0x4a   :  { %886 = vmatprep.subr.mxu0 %v1166_v1 }
  0x4d   :  { %887 = vmatpush3.xpose.msra.mxu0 %v61_v16  ;;  %v1646_v16 = vld [vmem:[%s1761_s1 + $0x8] sm:$0xff]  ;;  %s717_s1 = sld [smem:[#allocation3 + $0x1]] }
  0x4e   :  { %961 = vmatprep.subr.mxu0 %v1166_v1 }
  0x50   :  { %889 = vmatmul.mubr.f32.vlgmr.msra.gmra.mxu0 %v1294_v17 }
  0x51   :  { %993 = vmatprep.mubr.msk.f32.mxu0 %vm1167_vm0, %v1166_v1  ;;  %962 = vmatpush3.msra.mxu0 %v1306_v28 }
  0x52   :  { %963 = vmatprep.subr.mxu0 %v1166_v1 }
  0x53   :  { %964 = vmatpush3.msra.mxu0 %v1311_v29 }
  0x54   :  { %965 = vmatprep.subr.mxu0 %v1166_v1 }
  0x55   :  { %966 = vmatpush3.msra.mxu0 %v1318_v30 }
  0x56   :  { %967 = vmatprep.subr.mxu0 %v1166_v1 }
  0x57   :  { %968 = vmatpush3.msra.mxu0 %v1325_v31 }
  0x58   :  { %969 = vmatprep.subr.mxu0 %v1166_v1 }
  0x59   :  { %970 = vmatpush3.msra.mxu0 %v1332_v32 }
  0x5a   :  { %971 = vmatprep.subr.mxu0 %v1166_v1 }
  0x5b   :  { %972 = vmatpush3.msra.mxu0 %v1339_v33 }
  0x5c   :  { %973 = vmatprep.subr.mxu0 %v1166_v1 }
  0x5d   :  { %974 = vmatpush3.msra.mxu0 %v1346_v34 }
  0x5e   :  { %975 = vmatprep.subr.mxu0 %v1166_v1 }
  0x5f   :  { %976 = vmatpush3.msra.mxu0 %v1353_v35 }
  0x60   :  { %977 = vmatprep.subr.mxu0 %v1166_v1 }
  0x61   :  { %978 = vmatpush3.msra.mxu0 %v1360_v36 }
  0x62   :  { %979 = vmatprep.subr.mxu0 %v1166_v1 }
  0x63   :  { %980 = vmatpush3.msra.mxu0 %v1367_v38 }
  0x64   :  { %981 = vmatprep.subr.mxu0 %v1166_v1 }
  0x65   :  { %982 = vmatpush3.msra.mxu0 %v1374_v39 }
  0x66   :  { %983 = vmatprep.subr.mxu0 %v1166_v1 }
  0x67   :  { %984 = vmatpush3.msra.mxu0 %v1381_v40 }
  0x68   :  { %985 = vmatprep.subr.mxu0 %v1166_v1 }
  0x69   :  { %986 = vmatpush3.msra.mxu0 %v1388_v41 }
  0x6a   :  { %987 = vmatprep.subr.mxu0 %v1166_v1 }
  0x6b   :  { %988 = vmatpush3.msra.mxu0 %v1395_v42 }
  0x6c   :  { %989 = vmatprep.subr.mxu0 %v1166_v1 }
  0x6d   :  { %990 = vmatpush3.msra.mxu0 %v1402_v43 }
  0x6e   :  { %991 = vmatprep.subr.mxu0 %v1166_v1 }
  0x6f   :  { %992 = vmatpush3.msra.mxu0 %v26_v8 }
  0x70   :  { %1031 = vmatprep.subr.mxu0 %v1166_v1 }
 0x110   :  { %v143_v21 = vpop.f32.mrf.mxu0 }
 0x111   :  { %v151_v22 = vsel %vm150_vm1, %v143_v21, -1e+30 }
 0x112   :  { %v890_v23 = vpop.f32.mrf.mxu0  ;;  %152 = vmax.xlane.f32.xlu0 %v151_v22 }
 0x19b   :  { %v153_v24 = vpop.xlane.xlu0 %152 }
 0x19c   :  { %v154_v25 = vsub.f32 %v151_v22, %v153_v24  ;;  %v465_v22 = vstv %s717_s1 }
 0x19d   :  { %vm466_vm2 = vcmp.lt.s32.totalorder %v1300_v19, %v465_v22 }
 0x19e   :  { %v155_v26 = vmul.f32 1.442695, %v154_v25 }
 0x1a0   :  { %1139 = vpow2.f32 %v155_v26 }
 0x1ad   :  { %v1140_v27 = vpop.eup %1139 }
 0x1ae   :  { %157 = vadd.xlane.f32.xlu0 %v1140_v27 }
 0x237   :  { %v158_v37 = vpop.xlane.xlu0 %157 }
 0x238   :  { %1141 = vrcp.f32 %v158_v37 }
 0x245   :  { %v1142_v44 = vpop.eup %1141 }
 0x246   :  { %v160_v45 = vmul.f32 %v1142_v44, %v1140_v27 }
 0x248   :  { %924 = vmatmul.mubr.f32.vlgmr.msra.gmra.mxu1 %v160_v45  ;;  %373 = vst [vmem:[%s1766_s6] sm:$0xff] %v160_v45 }
 0x249   :  { %927 = vmatpush3.msra.mxu1 %v1410_v46  ;;  %958 = vmatprep.mubr.msk.f32.mxu1 %vm1167_vm0, %v1166_v1 }
 0x24a   :  { %928 = vmatprep.subr.mxu1 %v1166_v1 }
 0x24b   :  { %929 = vmatpush3.msra.mxu1 %v1419_v47 }
 0x24c   :  { %930 = vmatprep.subr.mxu1 %v1166_v1 }
 0x24d   :  { %931 = vmatpush3.msra.mxu1 %v1428_v48 }
 0x24e   :  { %932 = vmatprep.subr.mxu1 %v1166_v1 }
 0x24f   :  { %933 = vmatpush3.msra.mxu1 %v1435_v49 }
 0x250   :  { %934 = vmatprep.subr.mxu1 %v1166_v1 }
 0x251   :  { %935 = vmatpush3.msra.mxu1 %v1442_v50 }
 0x252   :  { %936 = vmatprep.subr.mxu1 %v1166_v1 }
 0x253   :  { %937 = vmatpush3.msra.mxu1 %v1449_v51 }
 0x254   :  { %938 = vmatprep.subr.mxu1 %v1166_v1 }
 0x255   :  { %939 = vmatpush3.msra.mxu1 %v1456_v52 }
 0x256   :  { %940 = vmatprep.subr.mxu1 %v1166_v1 }
 0x257   :  { %941 = vmatpush3.msra.mxu1 %v1463_v53 }
 0x258   :  { %942 = vmatprep.subr.mxu1 %v1166_v1 }
 0x259   :  { %943 = vmatpush3.msra.mxu1 %v1470_v54 }
 0x25a   :  { %944 = vmatprep.subr.mxu1 %v1166_v1 }
 0x25b   :  { %945 = vmatpush3.msra.mxu1 %v1477_v55 }
 0x25c   :  { %946 = vmatprep.subr.mxu1 %v1166_v1 }
 0x25d   :  { %947 = vmatpush3.msra.mxu1 %v1484_v56 }
 0x25e   :  { %948 = vmatprep.subr.mxu1 %v1166_v1 }
 0x25f   :  { %949 = vmatpush3.msra.mxu1 %v1491_v57 }
 0x260   :  { %950 = vmatprep.subr.mxu1 %v1166_v1 }
 0x261   :  { %951 = vmatpush3.msra.mxu1 %v1498_v58 }
 0x262   :  { %952 = vmatprep.subr.mxu1 %v1166_v1 }
 0x263   :  { %953 = vmatpush3.msra.mxu1 %v1505_v59 }
 0x264   :  { %954 = vmatprep.subr.mxu1 %v1166_v1 }
 0x265   :  { %955 = vmatpush3.msra.mxu1 %v1512_v60 }
 0x266   :  { %956 = vmatprep.subr.mxu1 %v1166_v1 }
 0x267   :  { %957 = vmatpush3.msra.mxu1 %v1519_v61 }
 0x268   :  { %959 = vmatmul.mubr.f32.vlgmr.msra.gmra.mxu1 %v1294_v17  ;;  %996 = vmatprep.subr.mxu1 %v1166_v1 }
 0x269   :  { %997 = vmatpush3.xpose.msra.mxu1 %v1526_v62  ;;  %1028 = vmatprep.mubr.msk.f32.mxu1 %vm1167_vm0, %v1166_v1 }
 0x26a   :  { %998 = vmatprep.subr.mxu1 %v1166_v1 }
 0x26d   :  { %999 = vmatpush3.xpose.msra.mxu1 %v1538_v63 }
 0x26e   :  { %1000 = vmatprep.subr.mxu1 %v1166_v1 }
 0x271   :  { %1001 = vmatpush3.xpose.msra.mxu1 %v1545_v0 }
 0x272   :  { %1002 = vmatprep.subr.mxu1 %v1166_v1 }
 0x275   :  { %1003 = vmatpush3.xpose.msra.mxu1 %v1552_v2 }
 0x276   :  { %1004 = vmatprep.subr.mxu1 %v1166_v1 }
 0x279   :  { %1005 = vmatpush3.xpose.msra.mxu1 %v1559_v3 }
 0x27a   :  { %1006 = vmatprep.subr.mxu1 %v1166_v1 }
 0x27d   :  { %1007 = vmatpush3.xpose.msra.mxu1 %v1566_v4 }
 0x27e   :  { %1008 = vmatprep.subr.mxu1 %v1166_v1 }
 0x281   :  { %1009 = vmatpush3.xpose.msra.mxu1 %v1573_v5 }
 0x282   :  { %1010 = vmatprep.subr.mxu1 %v1166_v1 }
 0x285   :  { %1011 = vmatpush3.xpose.msra.mxu1 %v1580_v6 }
 0x286   :  { %1012 = vmatprep.subr.mxu1 %v1166_v1 }
 0x289   :  { %1013 = vmatpush3.xpose.msra.mxu1 %v1587_v7 }
 0x28a   :  { %1014 = vmatprep.subr.mxu1 %v1166_v1 }
 0x28d   :  { %1015 = vmatpush3.xpose.msra.mxu1 %v1597_v9 }
 0x28e   :  { %1016 = vmatprep.subr.mxu1 %v1166_v1 }
 0x291   :  { %1017 = vmatpush3.xpose.msra.mxu1 %v1605_v10 }
 0x292   :  { %1018 = vmatprep.subr.mxu1 %v1166_v1 }
 0x295   :  { %1019 = vmatpush3.xpose.msra.mxu1 %v1612_v11 }
 0x296   :  { %1020 = vmatprep.subr.mxu1 %v1166_v1 }
 0x299   :  { %1021 = vmatpush3.xpose.msra.mxu1 %v1619_v12 }
 0x29a   :  { %1022 = vmatprep.subr.mxu1 %v1166_v1 }
 0x29d   :  { %1023 = vmatpush3.xpose.msra.mxu1 %v1626_v13 }
 0x29e   :  { %1024 = vmatprep.subr.mxu1 %v1166_v1 }
 0x2a1   :  { %1025 = vmatpush3.xpose.msra.mxu1 %v1633_v14 }
 0x2a2   :  { %1026 = vmatprep.subr.mxu1 %v1166_v1 }
 0x2a5   :  { %1027 = vmatpush3.xpose.msra.mxu1 %v1640_v15 }
 0x2a6   :  { %1101 = vmatprep.subr.mxu1 %v1166_v1 }
 0x2a8   :  { %1029 = vmatmul.mubr.f32.vlgmr.msra.gmra.mxu1 %v1646_v16 }
 0x2a9   :  { %1102 = vmatpush3.msra.mxu1 %v1306_v28  ;;  %1133 = vmatprep.mubr.msk.f32.mxu1 %vm1167_vm0, %v1166_v1 }
 0x2aa   :  { %1103 = vmatprep.subr.mxu1 %v1166_v1 }
 0x2ab   :  { %1104 = vmatpush3.msra.mxu1 %v1311_v29 }
 0x2ac   :  { %1105 = vmatprep.subr.mxu1 %v1166_v1 }
 0x2ad   :  { %1106 = vmatpush3.msra.mxu1 %v1318_v30 }
 0x2ae   :  { %1107 = vmatprep.subr.mxu1 %v1166_v1 }
 0x2af   :  { %1108 = vmatpush3.msra.mxu1 %v1325_v31 }
 0x2b0   :  { %1109 = vmatprep.subr.mxu1 %v1166_v1 }
 0x2b1   :  { %1110 = vmatpush3.msra.mxu1 %v1332_v32 }
 0x2b2   :  { %1111 = vmatprep.subr.mxu1 %v1166_v1 }
 0x2b3   :  { %1112 = vmatpush3.msra.mxu1 %v1339_v33 }
 0x2b4   :  { %1113 = vmatprep.subr.mxu1 %v1166_v1 }
 0x2b5   :  { %1114 = vmatpush3.msra.mxu1 %v1346_v34 }
 0x2b6   :  { %1115 = vmatprep.subr.mxu1 %v1166_v1 }
 0x2b7   :  { %1116 = vmatpush3.msra.mxu1 %v1353_v35 }
 0x2b8   :  { %1117 = vmatprep.subr.mxu1 %v1166_v1 }
 0x2b9   :  { %1118 = vmatpush3.msra.mxu1 %v1360_v36 }
 0x2ba   :  { %1119 = vmatprep.subr.mxu1 %v1166_v1 }
 0x2bb   :  { %1120 = vmatpush3.msra.mxu1 %v1367_v38 }
 0x2bc   :  { %1121 = vmatprep.subr.mxu1 %v1166_v1 }
 0x2bd   :  { %1122 = vmatpush3.msra.mxu1 %v1374_v39 }
 0x2be   :  { %1123 = vmatprep.subr.mxu1 %v1166_v1 }
 0x2bf   :  { %1124 = vmatpush3.msra.mxu1 %v1381_v40 }
 0x2c0   :  { %1125 = vmatprep.subr.mxu1 %v1166_v1 }
 0x2c1   :  { %1126 = vmatpush3.msra.mxu1 %v1388_v41 }
 0x2c2   :  { %1127 = vmatprep.subr.mxu1 %v1166_v1 }
 0x2c3   :  { %1128 = vmatpush3.msra.mxu1 %v1395_v42 }
 0x2c4   :  { %1129 = vmatprep.subr.mxu1 %v1166_v1 }
 0x2c5   :  { %1130 = vmatpush3.msra.mxu1 %v1402_v43 }
 0x2c6   :  { %1131 = vmatprep.subr.mxu1 %v1166_v1 }
 0x2c7   :  { %1132 = vmatpush3.msra.mxu1 %v26_v8 }
 0x308   :  { %v227_v17 = vpop.f32.mrf.mxu1 }
 0x309   :  { %994 = vmatmul.mubr.f32.vlgmr.msra.gmra.mxu0 %v227_v17 }
 0x30a   :  { %v925_v18 = vpop.f32.mrf.mxu1  ;;  %1032 = vmatpush3.msra.mxu0 %v1526_v62  ;;  %1063 = vmatprep.mubr.msk.f32.mxu0 %vm1167_vm0, %v1166_v1 }
 0x30b   :  { %1033 = vmatprep.subr.mxu0 %v1166_v1 }
 0x30c   :  { %1034 = vmatpush3.msra.mxu0 %v1538_v63 }
 0x30d   :  { %1035 = vmatprep.subr.mxu0 %v1166_v1 }
 0x30e   :  { %1036 = vmatpush3.msra.mxu0 %v1545_v0 }
 0x30f   :  { %1037 = vmatprep.subr.mxu0 %v1166_v1 }
 0x310   :  { %1038 = vmatpush3.msra.mxu0 %v1552_v2 }
 0x311   :  { %1039 = vmatprep.subr.mxu0 %v1166_v1 }
 0x312   :  { %1040 = vmatpush3.msra.mxu0 %v1559_v3 }
 0x313   :  { %1041 = vmatprep.subr.mxu0 %v1166_v1 }
 0x314   :  { %1042 = vmatpush3.msra.mxu0 %v1566_v4 }
 0x315   :  { %1043 = vmatprep.subr.mxu0 %v1166_v1 }
 0x316   :  { %1044 = vmatpush3.msra.mxu0 %v1573_v5 }
 0x317   :  { %1045 = vmatprep.subr.mxu0 %v1166_v1 }
 0x318   :  { %1046 = vmatpush3.msra.mxu0 %v1580_v6 }
 0x319   :  { %1047 = vmatprep.subr.mxu0 %v1166_v1 }
 0x31a   :  { %1048 = vmatpush3.msra.mxu0 %v1587_v7 }
 0x31b   :  { %1049 = vmatprep.subr.mxu0 %v1166_v1 }
 0x31c   :  { %1050 = vmatpush3.msra.mxu0 %v1597_v9 }
 0x31d   :  { %1051 = vmatprep.subr.mxu0 %v1166_v1 }
 0x31e   :  { %1052 = vmatpush3.msra.mxu0 %v1605_v10 }
 0x31f   :  { %1053 = vmatprep.subr.mxu0 %v1166_v1 }
 0x320   :  { %1054 = vmatpush3.msra.mxu0 %v1612_v11 }
 0x321   :  { %1055 = vmatprep.subr.mxu0 %v1166_v1 }
 0x322   :  { %1056 = vmatpush3.msra.mxu0 %v1619_v12 }
 0x323   :  { %1057 = vmatprep.subr.mxu0 %v1166_v1 }
 0x324   :  { %1058 = vmatpush3.msra.mxu0 %v1626_v13 }
 0x325   :  { %1059 = vmatprep.subr.mxu0 %v1166_v1 }
 0x326   :  { %1060 = vmatpush3.msra.mxu0 %v1633_v14 }
 0x327   :  { %1061 = vmatprep.subr.mxu0 %v1166_v1 }
 0x328   :  { %v297_v20 = vpop.f32.mrf.mxu1  ;;  %1062 = vmatpush3.msra.mxu0 %v1640_v15 }
 0x329   :  { %1066 = vmatprep.subr.mxu0 %v1166_v1 }
 0x32a   :  { %v960_v21 = vpop.f32.mrf.mxu1 }
 0x368   :  { %v459_v23 = vpop.f32.mrf.mxu1 }
 0x369   :  { %v467_v24 = vsel %vm466_vm2, %v459_v23, -1e+30 }
 0x36a   :  { %468 = vmax.xlane.f32.xlu1 %v467_v24  ;;  %v1030_v25 = vpop.f32.mrf.mxu1 }
 0x3c9   :  { %v367_v26 = vpop.f32.mrf.mxu0 }
 0x3ca   :  { %v368_v27 = vadd.f32 %v367_v26, %v297_v20 }
 0x3cb   :  { %v995_v28 = vpop.f32.mrf.mxu0 }
 0x3cc   :  { %1143 = vtanh.f32 %v368_v27 }
 0x3d9   :  { %v1144_v29 = vpop.eup %1143 }
 0x3da   :  { %372 = vst [vmem:[%s1765_s5] sm:$0xff] %v1144_v29 }
 0x3f3   :  { %v469_v30 = vpop.xlane.xlu1 %468 }
 0x3f4   :  { %v470_v31 = vsub.f32 %v467_v24, %v469_v30 }
 0x3f6   :  { %v471_v32 = vmul.f32 1.442695, %v470_v31 }
 0x3f8   :  { %1145 = vpow2.f32 %v471_v32 }
 0x405   :  { %v1146_v33 = vpop.eup %1145 }
 0x406   :  { %473 = vadd.xlane.f32.xlu1 %v1146_v33 }
 0x48f   :  { %v474_v19 = vpop.xlane.xlu1 %473 }
 0x490   :  { %1147 = vrcp.f32 %v474_v19 }
 0x49d   :  { %v1148_v34 = vpop.eup %1147 }
 0x49e   :  { %v476_v35 = vmul.f32 %v1148_v34, %v1146_v33 }
 0x4a0   :  { %1064 = vmatmul.mubr.f32.vlgmr.msra.gmra.mxu0 %v476_v35  ;;  %719 = vst [vmem:[%s1766_s6 + $0x8] sm:$0xff] %v476_v35 }
 0x4a1   :  { %1067 = vmatpush3.msra.mxu0 %v1410_v46  ;;  %1098 = vmatprep.mubr.msk.f32.mxu0 %vm1167_vm0, %v1166_v1 }
 0x4a2   :  { %1068 = vmatprep.subr.mxu0 %v1166_v1 }
 0x4a3   :  { %1069 = vmatpush3.msra.mxu0 %v1419_v47 }
 0x4a4   :  { %1070 = vmatprep.subr.mxu0 %v1166_v1 }
 0x4a5   :  { %1071 = vmatpush3.msra.mxu0 %v1428_v48 }
 0x4a6   :  { %1072 = vmatprep.subr.mxu0 %v1166_v1 }
 0x4a7   :  { %1073 = vmatpush3.msra.mxu0 %v1435_v49 }
 0x4a8   :  { %1074 = vmatprep.subr.mxu0 %v1166_v1 }
 0x4a9   :  { %1075 = vmatpush3.msra.mxu0 %v1442_v50 }
 0x4aa   :  { %1076 = vmatprep.subr.mxu0 %v1166_v1 }
 0x4ab   :  { %1077 = vmatpush3.msra.mxu0 %v1449_v51 }
 0x4ac   :  { %1078 = vmatprep.subr.mxu0 %v1166_v1 }
 0x4ad   :  { %1079 = vmatpush3.msra.mxu0 %v1456_v52 }
 0x4ae   :  { %1080 = vmatprep.subr.mxu0 %v1166_v1 }
 0x4af   :  { %1081 = vmatpush3.msra.mxu0 %v1463_v53 }
 0x4b0   :  { %1082 = vmatprep.subr.mxu0 %v1166_v1 }
 0x4b1   :  { %1083 = vmatpush3.msra.mxu0 %v1470_v54 }
 0x4b2   :  { %1084 = vmatprep.subr.mxu0 %v1166_v1 }
 0x4b3   :  { %1085 = vmatpush3.msra.mxu0 %v1477_v55 }
 0x4b4   :  { %1086 = vmatprep.subr.mxu0 %v1166_v1 }
 0x4b5   :  { %1087 = vmatpush3.msra.mxu0 %v1484_v56 }
 0x4b6   :  { %1088 = vmatprep.subr.mxu0 %v1166_v1 }
 0x4b7   :  { %1089 = vmatpush3.msra.mxu0 %v1491_v57 }
 0x4b8   :  { %1090 = vmatprep.subr.mxu0 %v1166_v1 }
 0x4b9   :  { %1091 = vmatpush3.msra.mxu0 %v1498_v58 }
 0x4ba   :  { %1092 = vmatprep.subr.mxu0 %v1166_v1 }
 0x4bb   :  { %1093 = vmatpush3.msra.mxu0 %v1505_v59 }
 0x4bc   :  { %1094 = vmatprep.subr.mxu0 %v1166_v1 }
 0x4bd   :  { %1095 = vmatpush3.msra.mxu0 %v1512_v60 }
 0x4be   :  { %1096 = vmatprep.subr.mxu0 %v1166_v1 }
 0x4bf   :  { %1097 = vmatpush3.msra.mxu0 %v1519_v61 }
 0x4c0   :  { %1099 = vmatmul.mubr.f32.vlgmr.msra.gmra.mxu0 %v1646_v16 }
 0x560   :  { %v543_v36 = vpop.f32.mrf.mxu0 }
 0x561   :  { %1134 = vmatmul.mubr.f32.vlgmr.msra.gmra.mxu1 %v543_v36 }
 0x562   :  { %v1065_v37 = vpop.f32.mrf.mxu0 }
 0x580   :  { %v613_v38 = vpop.f32.mrf.mxu0 }
 0x582   :  { %v1100_v39 = vpop.f32.mrf.mxu0 }
 0x621   :  { %v683_v40 = vpop.f32.mrf.mxu1 }
 0x622   :  { %v684_v41 = vadd.f32 %v683_v40, %v613_v38 }
 0x623   :  { %v1135_v42 = vpop.f32.mrf.mxu1 }
 0x624   :  { %1149 = vtanh.f32 %v684_v41 }
 0x631   :  { %v1150_v43 = vpop.eup %1149 }
 0x632   :  { %718 = vst [vmem:[%s1765_s5 + $0x8] sm:$0xff] %v1150_v43 }

</bundles_post_ra>
